<compile_context>
chip_gen: v7x
topology: tpu7x:2x2x1
jax: 0.10.0
libtpu: 0.0.40
codegen_flags: <defaults>
</compile_context>

<pallas_src>
import functools

import jax
import jax.numpy as jnp
from jax import lax
from jax.experimental import pallas as pl
from jax.experimental.pallas import tpu as pltpu

_EPS = 1e-12      # torch F.normalize default eps (clamp on the norm)
_EPS_SQ = 1e-24   # clamp on the sum of squares (sqrt is monotone)
_MOM = 0.05       # memory momentum


# ----------------------------------------------------------------------------
# Shared math helpers (used both inside kernels and in plain JAX)
# ----------------------------------------------------------------------------
def _coeffs(sxx, smm, sxm):
    """Per-row scales (cmem, cx) such that out = cmem * memory + cx * x."""
    s_x = lax.rsqrt(jnp.maximum(sxx, _EPS_SQ))                  # 1 / max(||x||, eps)
    nrm2 = (_MOM * _MOM) * smm \
        + ((1.0 - _MOM) ** 2) * (sxx * s_x * s_x) \
        + (2.0 * _MOM * (1.0 - _MOM)) * (sxm * s_x)             # ||0.05*mem + 0.95*x_n||^2
    s_m = lax.rsqrt(jnp.maximum(nrm2, _EPS_SQ))                 # 1 / max(||m'||, eps)
    return _MOM * s_m, (1.0 - _MOM) * s_x * s_m


def _tile_lane_sums(x_ref, mem_ref, chunk):
    """Per-row, per-lane partial sums of x*x, m*m, x*m over one (B, T) tile.

    Lane-chunks (multiples of 128) are widened to f32 in-register and combined
    with VALU mul/add only; the single cross-lane (XLU) reduce is deferred to
    the caller's finalize step.  Chunking bounds f32 temporaries to (B, chunk).
    """
    width = x_ref.shape[-1]
    axx = amm = axm = None
    for c in range(width // chunk):
        lo = c * chunk
        x = x_ref[:, lo:lo + chunk].astype(jnp.float32)
        m = mem_ref[:, lo:lo + chunk].astype(jnp.float32)
        if axx is None:
            axx, amm, axm = x * x, m * m, x * m
        else:
            axx = axx + x * x
            amm = amm + m * m
            axm = axm + x * m
    return axx, amm, axm


# ----------------------------------------------------------------------------
# Variant 1: whole-array-resident kernel, lane-chunked body (small D fallback).
# ----------------------------------------------------------------------------
def _resident_kernel(x_ref, mem_ref, out_ref, *, chunk):
    if chunk is None:                       # D not a multiple of 128: full width
        x = x_ref[...].astype(jnp.float32)
        m = mem_ref[...].astype(jnp.float32)
        sxx = jnp.sum(x * x, axis=-1, keepdims=True)
        smm = jnp.sum(m * m, axis=-1, keepdims=True)
        sxm = jnp.sum(x * m, axis=-1, keepdims=True)
        cm, cx = _coeffs(sxx, smm, sxm)
        out_ref[...] = (cm * m + cx * x).astype(out_ref.dtype)
        return

    width = x_ref.shape[-1]
    axx, amm, axm = _tile_lane_sums(x_ref, mem_ref, chunk)
    cm, cx = _coeffs(jnp.sum(axx, axis=-1, keepdims=True),
                     jnp.sum(amm, axis=-1, keepdims=True),
                     jnp.sum(axm, axis=-1, keepdims=True))
    for c in range(width // chunk):         # chunked write: bounded f32 temps
        lo = c * chunk
        x = x_ref[:, lo:lo + chunk].astype(jnp.float32)
        m = mem_ref[:, lo:lo + chunk].astype(jnp.float32)
        out_ref[:, lo:lo + chunk] = (cm * m + cx * x).astype(out_ref.dtype)


# ----------------------------------------------------------------------------
# Variant 2: two-phase streamed kernel with a persistent VMEM cache.
# Phase 0: stream tiles from HBM once, cache in VMEM, accumulate lane sums.
# Phase 1: read from the VMEM cache only (inputs parked), scale and write.
# ----------------------------------------------------------------------------
def _streamed_cached_kernel(x_ref, mem_ref, out_ref,
                            xc_ref, mc_ref,                 # (B, D) native-dtype caches
                            sxx_ref, smm_ref, sxm_ref,      # (B, chunk) f32 lane sums
                            cmem_ref, cx_ref):              # (B, 1) f32 coefficients
    p = pl.program_id(0)            # phase: 0 = reduce + cache, 1 = scale + write
    d = pl.program_id(1)            # D-tile index
    nd = pl.num_programs(1)
    td = x_ref.shape[-1]
    chunk = sxx_ref.shape[-1]

    @pl.when(jnp.logical_and(p == 0, d == 0))
    def _init():
        sxx_ref[...] = jnp.zeros_like(sxx_ref)
        smm_ref[...] = jnp.zeros_like(smm_ref)
        sxm_ref[...] = jnp.zeros_like(sxm_ref)

    @pl.when(p == 0)
    def _reduce():
        off = pl.multiple_of(d * td, td)
        # Cache this HBM tile (native dtype) so phase 1 never re-reads HBM.
        xc_ref[:, pl.ds(off, td)] = x_ref[...]
        mc_ref[:, pl.ds(off, td)] = mem_ref[...]
        axx, amm, axm = _tile_lane_sums(x_ref, mem_ref, chunk)
        sxx_ref[...] += axx
        smm_ref[...] += amm
        sxm_ref[...] += axm

    @pl.when(jnp.logical_and(p == 0, d == nd - 1))
    def _finalize():
        sxx = jnp.sum(sxx_ref[...], axis=-1, keepdims=True)   # single XLU reduce
        smm = jnp.sum(smm_ref[...], axis=-1, keepdims=True)
        sxm = jnp.sum(sxm_ref[...], axis=-1, keepdims=True)
        cm, cx = _coeffs(sxx, smm, sxm)
        cmem_ref[...] = cm
        cx_ref[...] = cx

    @pl.when(p == 1)
    def _write():
        off = pl.multiple_of(d * td, td)
        x = xc_ref[:, pl.ds(off, td)].astype(jnp.float32)
        m = mc_ref[:, pl.ds(off, td)].astype(jnp.float32)
        out_ref[...] = (cmem_ref[...] * m + cx_ref[...] * x).astype(out_ref.dtype)


# ----------------------------------------------------------------------------
# Variant 3: two-call "split" structure (v7x megacore).  Kernel A reduces each
# D-segment ("parallel" over segments -> one per TensorCore); kernel B scales
# and writes with its D axis "parallel".  Correct (just not faster) on 1 TC.
# ----------------------------------------------------------------------------
def _split_reduce_kernel(x_ref, mem_ref, pxx_ref, pmm_ref, pxm_ref,
                         sxx_ref, smm_ref, sxm_ref):
    d = pl.program_id(1)
    nd = pl.num_programs(1)
    chunk = sxx_ref.shape[-1]

    @pl.when(d == 0)
    def _init():
        sxx_ref[...] = jnp.zeros_like(sxx_ref)
        smm_ref[...] = jnp.zeros_like(smm_ref)
        sxm_ref[...] = jnp.zeros_like(sxm_ref)

    axx, amm, axm = _tile_lane_sums(x_ref, mem_ref, chunk)
    sxx_ref[...] += axx
    smm_ref[...] += amm
    sxm_ref[...] += axm

    @pl.when(d == nd - 1)
    def _fin():
        pxx_ref[0, :, :] = jnp.sum(sxx_ref[...], axis=-1, keepdims=True)
        pmm_ref[0, :, :] = jnp.sum(smm_ref[...], axis=-1, keepdims=True)
        pxm_ref[0, :, :] = jnp.sum(sxm_ref[...], axis=-1, keepdims=True)


def _split_scale_kernel(cmem_ref, cx_ref, x_ref, mem_ref, out_ref):
    x = x_ref[...].astype(jnp.float32)
    m = mem_ref[...].astype(jnp.float32)
    out_ref[...] = (cmem_ref[...] * m + cx_ref[...] * x).astype(out_ref.dtype)


# ----------------------------------------------------------------------------
# Wrappers
# ----------------------------------------------------------------------------
def _vmem_capacity_bytes():
    try:
        return int(pltpu.get_tpu_info().vmem_capacity_bytes)
    except Exception:
        return 64 << 20          # conservative default (v7x per-core VMEM)


def _num_tensorcores():
    """Best-effort TC-per-chip count; falls back to 1 if unknown."""
    try:
        info = pltpu.get_tpu_info()
        for name in ("num_cores", "num_tensorcores", "tensorcore_count", "core_count"):
            v = getattr(info, name, None)
            if isinstance(v, int) and v > 0:
                return v
    except Exception:
        pass
    try:
        v = getattr(jax.devices()[0], "num_cores", None)
        if isinstance(v, int) and v > 0:
            return v
    except Exception:
        pass
    return 1


def _pick_chunk(width):
    for c in (1024, 512, 256, 128):       # bounded unroll + modest vreg pressure
        if width % c == 0:
            return c
    return None


def _pick_tile_d(D, requested):
    if requested is not None:
        if requested % 128 != 0 or D % requested != 0:
            raise ValueError("tile_d must be a multiple of 128 that divides D")
        return requested
    if D % 128 != 0:
        return None                         # not lane-tileable -> resident variant
    for td in (16384, 8192, 4096, 2048, 1024, 512, 256, 128):   # <=16K for v7x VMEM
        if td <= D and D % td == 0:
            return td
    return None


def _clamp_vmem(needed, cap):
    budget = cap - (8 << 20)                # headroom below physical VMEM
    return int(min(max(needed, 32 << 20), budget))


def _resident_call(x_flat, memory, out_dtype, cap):
    B, D = x_flat.shape
    chunk = _pick_chunk(D) if D % 128 == 0 else None
    io_bytes = B * D * (x_flat.dtype.itemsize + memory.dtype.itemsize
                        + jnp.dtype(out_dtype).itemsize)
    temp_bytes = (5 * B * D * 4) if chunk is None else (8 * B * chunk * 4)
    vmem_limit = _clamp_vmem(io_bytes + temp_bytes + (4 << 20), cap)
    return pl.pallas_call(
        functools.partial(_resident_kernel, chunk=chunk),
        out_shape=jax.ShapeDtypeStruct((B, D), out_dtype),
        in_specs=[pl.BlockSpec((B, D), lambda: (0, 0)),
                  pl.BlockSpec((B, D), lambda: (0, 0))],
        out_specs=pl.BlockSpec((B, D), lambda: (0, 0)),
        compiler_params=pltpu.CompilerParams(vmem_limit_bytes=vmem_limit),
    )(x_flat, memory)


def _streamed_call(x_flat, memory, tile_d, out_dtype, cap):
    B, D = x_flat.shape
    nd = D // tile_d
    chunk = _pick_chunk(tile_d)
    out_isz = jnp.dtype(out_dtype).itemsize

    cache_bytes = B * D * (x_flat.dtype.itemsize + memory.dtype.itemsize)
    work_bytes = (2 * B * tile_d * (x_flat.dtype.itemsize + memory.dtype.itemsize)
                  + 2 * B * tile_d * out_isz
                  + 3 * B * chunk * 4 + (1 << 20))
    vmem_limit = _clamp_vmem(cache_bytes + work_bytes + (4 << 20), cap)

    grid_spec = pltpu.PrefetchScalarGridSpec(
        num_scalar_prefetch=0,
        grid=(2, nd),                                   # (phase, D-tile)
        in_specs=[
            # Phase 0 walks the D-tiles; phase 1 parks on the LAST block, so the
            # block index never changes across/after the phase boundary and no
            # extra HBM fetches are issued while phase 1 reads the VMEM cache.
            pl.BlockSpec((B, tile_d), lambda p, d: (0, d * (1 - p) + (nd - 1) * p)),
            pl.BlockSpec((B, tile_d), lambda p, d: (0, d * (1 - p) + (nd - 1) * p)),
        ],
        # Output parked on block 0 during phase 0 (never written there and the
        # block index does not change until phase-1 writes begin, so no garbage
        # is flushed); phase 1 walks the blocks and writes them.
        out_specs=pl.BlockSpec((B, tile_d), lambda p, d: (0, d * p)),
        scratch_shapes=[
            pltpu.VMEM((B, D), x_flat.dtype),           # persistent x cache
            pltpu.VMEM((B, D), memory.dtype),           # persistent memory cache
            pltpu.VMEM((B, chunk), jnp.float32),        # sum x*x (per lane)
            pltpu.VMEM((B, chunk), jnp.float32),        # sum m*m
            pltpu.VMEM((B, chunk), jnp.float32),        # sum x*m
            pltpu.VMEM((B, 1), jnp.float32),            # 0.05 * s_m
            pltpu.VMEM((B, 1), jnp.float32),            # 0.95 * s_x * s_m
        ],
    )
    return pl.pallas_call(
        _streamed_cached_kernel,
        out_shape=jax.ShapeDtypeStruct((B, D), out_dtype),
        grid_spec=grid_spec,
        compiler_params=pltpu.CompilerParams(
            # Phase ordering + shared scratch require sequential execution.
            dimension_semantics=("arbitrary", "arbitrary"),
            vmem_limit_bytes=vmem_limit),
    )(x_flat, memory)


def _split_call(x_flat, memory, tile_d, out_dtype, cap):
    B, D = x_flat.shape
    nd = D // tile_d
    nseg = 2 if (nd % 2 == 0 and nd >= 2) else 1
    nd_per = nd // nseg
    chunk = _pick_chunk(tile_d)
    out_isz = jnp.dtype(out_dtype).itemsize

    work_bytes = (2 * B * tile_d * (x_flat.dtype.itemsize + memory.dtype.itemsize)
                  + 2 * B * tile_d * out_isz + 3 * B * chunk * 4)
    vmem_limit = _clamp_vmem(work_bytes + (8 << 20), cap)

    # Kernel A: per-segment row sums (segment axis "parallel" -> one per TC).
    pxx, pmm, pxm = pl.pallas_call(
        _split_reduce_kernel,
        out_shape=(jax.ShapeDtypeStruct((nseg, B, 1), jnp.float32),
                   jax.ShapeDtypeStruct((nseg, B, 1), jnp.float32),
                   jax.ShapeDtypeStruct((nseg, B, 1), jnp.float32)),
        grid_spec=pltpu.PrefetchScalarGridSpec(
            num_scalar_prefetch=0,
            grid=(nseg, nd_per),
            in_specs=[pl.BlockSpec((B, tile_d), lambda s, d: (0, s * nd_per + d)),
                      pl.BlockSpec((B, tile_d), lambda s, d: (0, s * nd_per + d))],
            out_specs=(pl.BlockSpec((1, B, 1), lambda s, d: (s, 0, 0)),
                       pl.BlockSpec((1, B, 1), lambda s, d: (s, 0, 0)),
                       pl.BlockSpec((1, B, 1), lambda s, d: (s, 0, 0))),
            scratch_shapes=[pltpu.VMEM((B, chunk), jnp.float32),
                            pltpu.VMEM((B, chunk), jnp.float32),
                            pltpu.VMEM((B, chunk), jnp.float32)]),
        compiler_params=pltpu.CompilerParams(
            dimension_semantics=("parallel", "arbitrary"),
            vmem_limit_bytes=vmem_limit),
    )(x_flat, memory)

    # Tiny cross-segment combine + coefficient math on (B, 1) arrays in JAX.
    cm, cx = _coeffs(jnp.sum(pxx, axis=0), jnp.sum(pmm, axis=0), jnp.sum(pxm, axis=0))

    # Kernel B: scale and write, D axis "parallel".
    return pl.pallas_call(
        _split_scale_kernel,
        out_shape=jax.ShapeDtypeStruct((B, D), out_dtype),
        grid_spec=pltpu.PrefetchScalarGridSpec(
            num_scalar_prefetch=0,
            grid=(nd,),
            in_specs=[pl.BlockSpec((B, 1), lambda d: (0, 0)),
                      pl.BlockSpec((B, 1), lambda d: (0, 0)),
                      pl.BlockSpec((B, tile_d), lambda d: (0, d)),
                      pl.BlockSpec((B, tile_d), lambda d: (0, d))],
            out_specs=pl.BlockSpec((B, tile_d), lambda d: (0, d))),
        compiler_params=pltpu.CompilerParams(
            dimension_semantics=("parallel",),
            vmem_limit_bytes=vmem_limit),
    )(cm, cx, x_flat, memory)


def linear_average_forward(x, memory, *, variant=None, tile_d=None, out_dtype=None):
    """x: any shape with leading batch B; memory: (B, D), D = prod(x.shape[1:])."""
    B = x.shape[0]
    x_flat = x.reshape(B, -1)                     # native dtype; widened in-kernel
    D = x_flat.shape[1]
    assert memory.shape == (B, D), "memory must match flattened x"
    if variant not in (None, "resident", "streamed", "split"):
        raise ValueError(f"unknown variant: {variant}")
    if out_dtype is None:
        out_dtype = jnp.result_type(x_flat.dtype, memory.dtype)   # torch promotion

    cap = _vmem_capacity_bytes()
    td = _pick_tile_d(D, tile_d)

    if variant is None:
        if td is None or D <= 4096:
            variant = "resident"                  # small / non-tileable D
        else:
            cache_bytes = B * D * (x_flat.dtype.itemsize + memory.dtype.itemsize)
            cache_fits = cache_bytes + (12 << 20) <= cap - (8 << 20)
            if _num_tensorcores() >= 2:
                variant = "split"                 # v7x: use both TensorCores
            elif cache_fits:
                variant = "streamed"              # 1-pass HBM traffic
            else:
                variant = "split"                 # cache too big: bounded VMEM path
    if variant in ("streamed", "split") and td is None:
        variant = "resident"

    if variant == "streamed":
        return _streamed_call(x_flat, memory, td, out_dtype, cap)
    if variant == "split":
        return _split_call(x_flat, memory, td, out_dtype, cap)
    return _resident_call(x_flat, memory, out_dtype, cap)


# ----------------------------------------------------------------------------
# Pure-JAX reference (faithful to the PyTorch forward)
# ----------------------------------------------------------------------------
def _reference(x, memory):
    B = x.shape[0]
    xf = x.reshape(B, -1).astype(jnp.float32)
    xf = xf / jnp.maximum(jnp.linalg.norm(xf, axis=1, keepdims=True), _EPS)
    m = memory.astype(jnp.float32) * _MOM + (1.0 - _MOM) * xf
    m = m / jnp.maximum(jnp.linalg.norm(m, axis=1, keepdims=True), _EPS)
    return m


if __name__ == "__main__":
    # The module registers memory of shape (8, 393216) -> batch must be 8.
    # Use a small feature size (4 * 16 * 16 = 1024) for the self-test.
    key = jax.random.PRNGKey(0)
    B, C, H, W = 8, 4, 16, 16
    D = C * H * W

    x = jax.random.normal(key, (B, C, H, W), dtype=jnp.float32)   # NCHW input
    memory = jnp.ones((B, D), dtype=jnp.float32)                  # buffer init (ones)
    ref = _reference(x, memory)

    # 1) Auto-selected path (resident at this small D), chunked body.
    out = jax.block_until_ready(linear_average_forward(x, memory))
    assert out.shape == (B, D) and out.dtype == jnp.float32
    assert jnp.allclose(out, ref, atol=1e-4, rtol=1e-3), "auto/resident mismatch"

    # 2) Streamed two-phase path with the persistent VMEM cache, forced with a
    #    small tile so the multi-tile reduce -> cached-write pipeline runs.
    out_s = jax.block_until_ready(
        linear_average_forward(x, memory, variant="streamed", tile_d=256))
    assert jnp.allclose(out_s, ref, atol=1e-4, rtol=1e-3), "streamed mismatch"

    # 3) Two-call split structure (v7x megacore design); correct on any chip.
    out_p = jax.block_until_ready(
        linear_average_forward(x, memory, variant="split", tile_d=256))
    assert jnp.allclose(out_p, ref, atol=1e-4, rtol=1e-3), "split mismatch"

    # 4) bf16 activations + f32 memory (output stays f32), streamed cache in bf16.
    x_bf = x.astype(jnp.bfloat16)
    ref_bf = _reference(x_bf, memory)
    out_bf = jax.block_until_ready(
        linear_average_forward(x_bf, memory, variant="streamed", tile_d=128))
    assert out_bf.dtype == jnp.float32
    assert jnp.allclose(out_bf, ref_bf, atol=2e-3, rtol=2e-2), "bf16-x mismatch"

    # 5) bf16 activations + bf16 memory -> bf16 output (write-traffic reduction).
    mem_bf = memory.astype(jnp.bfloat16)
    ref_bb = _reference(x_bf, mem_bf)
    out_bb = jax.block_until_ready(linear_average_forward(x_bf, mem_bf))
    assert out_bb.dtype == jnp.bfloat16
    assert jnp.allclose(out_bb.astype(jnp.float32), ref_bb,
                        atol=5e-3, rtol=5e-2), "bf16-out mismatch"

    # TODO(synk): backward of LinearAverageOp (gradOutput.resize_as_(x) pass-through)
    # is autograd-only and not implemented here.
    print("KERNEL_OK")
</pallas_src>

<mosaic_0001>
module attributes {stable_mosaic.version = 11 : i64} {
  func.func @_resident_kernel(%arg0: memref<8x1024xf32, #tpu.memory_space<vmem>>, %arg1: memref<8x1024xf32, #tpu.memory_space<vmem>>, %arg2: memref<8x1024xf32, #tpu.memory_space<vmem>>) attributes {dimension_semantics = [], scalar_prefetch = 0 : i64, scratch_operands = 0 : i64, tpu.core_type = #tpu.core_type<tc>} {
    %c0 = arith.constant 0 : index
    %c0_0 = arith.constant 0 : index
    %0 = vector.load %arg0[%c0, %c0_0] : memref<8x1024xf32, #tpu.memory_space<vmem>>, vector<8x1024xf32>
    %c0_1 = arith.constant 0 : index
    %c0_2 = arith.constant 0 : index
    %1 = vector.load %arg1[%c0_1, %c0_2] : memref<8x1024xf32, #tpu.memory_space<vmem>>, vector<8x1024xf32>
    %2 = arith.mulf %0, %0 : vector<8x1024xf32>
    %3 = arith.mulf %1, %1 : vector<8x1024xf32>
    %4 = arith.mulf %0, %1 : vector<8x1024xf32>
    %cst = arith.constant dense<0.000000e+00> : vector<8xf32>
    %5 = vector.multi_reduction <add>, %2, %cst [1] : vector<8x1024xf32> to vector<8xf32>
    %6 = vector.shape_cast %5 : vector<8xf32> to vector<8x1xf32>
    %cst_3 = arith.constant dense<0.000000e+00> : vector<8xf32>
    %7 = vector.multi_reduction <add>, %3, %cst_3 [1] : vector<8x1024xf32> to vector<8xf32>
    %8 = vector.shape_cast %7 : vector<8xf32> to vector<8x1xf32>
    %cst_4 = arith.constant dense<0.000000e+00> : vector<8xf32>
    %9 = vector.multi_reduction <add>, %4, %cst_4 [1] : vector<8x1024xf32> to vector<8xf32>
    %10 = vector.shape_cast %9 : vector<8xf32> to vector<8x1xf32>
    %cst_5 = arith.constant 1.000000e-24 : f32
    %11 = vector.broadcast %cst_5 : f32 to vector<8x1xf32>
    %12 = arith.maximumf %6, %11 : vector<8x1xf32>
    %13 = math.rsqrt %12 : vector<8x1xf32>
    %cst_6 = arith.constant 2.500000e-03 : f32
    %14 = vector.broadcast %cst_6 : f32 to vector<8x1xf32>
    %15 = arith.mulf %14, %8 : vector<8x1xf32>
    %16 = arith.mulf %6, %13 : vector<8x1xf32>
    %17 = arith.mulf %16, %13 : vector<8x1xf32>
    %cst_7 = arith.constant 0.902499973 : f32
    %18 = vector.broadcast %cst_7 : f32 to vector<8x1xf32>
    %19 = arith.mulf %18, %17 : vector<8x1xf32>
    %20 = arith.addf %15, %19 : vector<8x1xf32>
    %21 = arith.mulf %10, %13 : vector<8x1xf32>
    %cst_8 = arith.constant 0.0949999988 : f32
    %22 = vector.broadcast %cst_8 : f32 to vector<8x1xf32>
    %23 = arith.mulf %22, %21 : vector<8x1xf32>
    %24 = arith.addf %20, %23 : vector<8x1xf32>
    %cst_9 = arith.constant 1.000000e-24 : f32
    %25 = vector.broadcast %cst_9 : f32 to vector<8x1xf32>
    %26 = arith.maximumf %24, %25 : vector<8x1xf32>
    %27 = math.rsqrt %26 : vector<8x1xf32>
    %cst_10 = arith.constant 5.000000e-02 : f32
    %28 = vector.broadcast %cst_10 : f32 to vector<8x1xf32>
    %29 = arith.mulf %28, %27 : vector<8x1xf32>
    %cst_11 = arith.constant 0.949999988 : f32
    %30 = vector.broadcast %cst_11 : f32 to vector<8x1xf32>
    %31 = arith.mulf %30, %13 : vector<8x1xf32>
    %32 = arith.mulf %31, %27 : vector<8x1xf32>
    %c0_12 = arith.constant 0 : index
    %c0_13 = arith.constant 0 : index
    %33 = vector.load %arg0[%c0_12, %c0_13] : memref<8x1024xf32, #tpu.memory_space<vmem>>, vector<8x1024xf32>
    %c0_14 = arith.constant 0 : index
    %c0_15 = arith.constant 0 : index
    %34 = vector.load %arg1[%c0_14, %c0_15] : memref<8x1024xf32, #tpu.memory_space<vmem>>, vector<8x1024xf32>
    %35 = vector.broadcast %29 : vector<8x1xf32> to vector<8x1024xf32>
    %36 = arith.mulf %35, %34 : vector<8x1024xf32>
    %37 = vector.broadcast %32 : vector<8x1xf32> to vector<8x1024xf32>
    %38 = arith.mulf %37, %33 : vector<8x1024xf32>
    %39 = arith.addf %36, %38 : vector<8x1024xf32>
    %c0_16 = arith.constant 0 : index
    %c0_17 = arith.constant 0 : index
    %40 = vector.load %arg2[%c0_16, %c0_17] : memref<8x1024xf32, #tpu.memory_space<vmem>>, vector<8x1024xf32>
    tpu.vector_store %arg2[%c0_16, %c0_17], %39 {strides = array<i32>} : memref<8x1024xf32, #tpu.memory_space<vmem>>, vector<8x1024xf32>,
    return
  }
}

</mosaic_0001>

<bundles_post_ra>
// kernel: tpu_custom_call.1
= control target key start
LH: loop header
LB: loop body
LE: loop exit
PB: predicated region body
PF: predicated region fallthrough
CT: control target
= control target key end

     0   :  { %7 = vsyncpa [#allocation3], 0  ;;  %s377_s0 = inlined_call_operand.hbm [shape: f32[8,1024], index: 0, kind: input, shape index: {}]   ;;  %s378_s1 = inlined_call_operand.hbm [shape: f32[8,1024], index: 1, kind: input, shape index: {}]   ;;  %s379_s2 = inlined_call_operand.hbm [shape: f32[8,1024], index: 2, kind: output, shape index: {}]  }
   0x1   :  { %8 = vsyncpa [#allocation6], 0 }
   0x2   :  { %9 = vsyncpa [#allocation4], 0  ;;  %s245_s9 = smov [#allocation2]   ;;  %s246_s11 = smov [#allocation5]  }
   0x3   :  { %s16_s10 = sshll.u32 %s245_s9, 4  ;;  %s26_s12 = sshll.u32 %s246_s11, 4  ;;  %s17_s10 = int_to_ptr.vmem [resolvable:$true] %s16_s10  ;;  %s27_s12 = int_to_ptr.vmem [resolvable:$true] %s26_s12 }
   0x4   :  { %s173_s15 = scalar_lea.hbm %s377_s0, 1024 }
   0x5   :  { %p174_p0 = scmp.ne.s32.totalorder %s377_s0, %s173_s15  ;;  %p177_p1 = scmp.lt.u32.totalorder %s173_s15, %s377_s0 }
   0x7   :  { %p179_p2 = pnand %p177_p1, %p174_p0 }
   0x9   :  { %182 = shalt.err (!%p179_p2)
}
   0xa   :  { %s183_s20 = scalar_lea.vmem %s17_s10, 1024  ;;  %p188_p4 = scmp.lt.s32.totalorder %s17_s10, %s17_s10 }
   0xb   :  { %p184_p3 = scmp.ne.s32.totalorder %s17_s10, %s183_s20  ;;  %p189_p5 = scmp.lt.s32.totalorder %s183_s20, %s183_s20 }
   0xd   :  { %p190_p6 = por %p189_p5, %p188_p4 }
   0xf   :  { %p191_p7 = pnand %p190_p6, %p184_p3 }
  0x11   :  { %194 = shalt.err (!%p191_p7)
}
  0x12   :  { %19 = dma.hbm_to_vmem [thread:$0]  %s377_s0, 1024, %s17_s10, [#allocation3]  }
  0x13   :  { %s195_s25 = scalar_lea.hbm %s378_s1, 1024 }
  0x14   :  { %p196_p8 = scmp.ne.s32.totalorder %s378_s1, %s195_s25  ;;  %p199_p9 = scmp.lt.u32.totalorder %s195_s25, %s378_s1 }
  0x16   :  { %p201_p10 = pnand %p199_p9, %p196_p8 }
  0x18   :  { %204 = shalt.err (!%p201_p10)
}
  0x19   :  { %s205_s30 = scalar_lea.vmem %s27_s12, 1024  ;;  %p210_p12 = scmp.lt.s32.totalorder %s27_s12, %s27_s12 }
  0x1a   :  { %p206_p11 = scmp.ne.s32.totalorder %s27_s12, %s205_s30  ;;  %p211_p13 = scmp.lt.s32.totalorder %s205_s30, %s205_s30 }
  0x1c   :  { %p212_p0 = por %p211_p13, %p210_p12 }
  0x1e   :  { %p213_p1 = pnand %p212_p0, %p206_p11 }
  0x20   :  { %216 = shalt.err (!%p213_p1)
}
  0x21   :  { %29 = dma.hbm_to_vmem [thread:$0]  %s378_s1, 1024, %s27_s12, [#allocation6]  }
  0x22   :  { %239 = dma.done.wait [#allocation3], 1024  }
  0x23   :  { %240 = vsyncadd [#allocation3], 4294966272 }
  0x24   :  { %241 = dma.done.wait [#allocation6], 1024  }
  0x25   :  { %242 = vsyncadd [#allocation6], 4294966272  ;;  %v287_v0 = vld [vmem:[#allocation2] sm:$0xff]  ;;  %v289_v1 = vld [vmem:[#allocation2 + $0x8] sm:$0xff]  ;;  %s247_s1 = smov [#allocation7]  }
  0x26   :  { %v291_v2 = vld [vmem:[#allocation2 + $0x10] sm:$0xff]  ;;  %v293_v3 = vld [vmem:[#allocation2 + $0x18] sm:$0xff]  ;;  %v52_v4 = vmul.f32 %v287_v0, %v287_v0  ;;  %v53_v5 = vmul.f32 %v289_v1, %v289_v1  ;;  %v301_v7 = vld [vmem:[#allocation2 + $0x20] sm:$0xff]  ;;  %s156_s4 = sshll.u32 %s247_s1, 4  ;;  %s157_s4 = int_to_ptr.vmem [resolvable:$true] %s156_s4 }
  0x27   :  { %v54_v6 = vmul.f32 %v291_v2, %v291_v2  ;;  %v303_v8 = vld [vmem:[#allocation5] sm:$0xff]  ;;  %v55_v9 = vmul.f32 %v293_v3, %v293_v3  ;;  %v307_v11 = vld [vmem:[#allocation5 + $0x8] sm:$0xff]  ;;  %v309_v12 = vld [vmem:[#allocation5 + $0x10] sm:$0xff]  ;;  %v56_v19 = vmul.f32 %v301_v7, %v301_v7  ;;  %s217_s5 = scalar_lea.vmem %s157_s4, 1024  ;;  %p222_p3 = scmp.lt.s32.totalorder %s157_s4, %s157_s4 }
  0x28   :  { %v76_v10 = vadd.f32 %v53_v5, %v52_v4  ;;  %v311_v13 = vld [vmem:[#allocation5 + $0x18] sm:$0xff]  ;;  %v68_v14 = vmul.f32 %v303_v8, %v287_v0  ;;  %v315_v15 = vld [vmem:[#allocation2 + $0x28] sm:$0xff]  ;;  %v69_v16 = vmul.f32 %v307_v11, %v289_v1  ;;  %v70_v17 = vmul.f32 %v309_v12, %v291_v2  ;;  %v325_v21 = vld [vmem:[#allocation5 + $0x20] sm:$0xff]  ;;  %p218_p2 = scmp.ne.s32.totalorder %s157_s4, %s217_s5  ;;  %p223_p4 = scmp.lt.s32.totalorder %s217_s5, %s217_s5 }
  0x29   :  { %v60_v18 = vmul.f32 %v303_v8, %v303_v8  ;;  %v327_v22 = vld [vmem:[#allocation2 + $0x30] sm:$0xff]  ;;  %v71_v23 = vmul.f32 %v311_v13, %v293_v3  ;;  %v61_v25 = vmul.f32 %v307_v11, %v307_v11  ;;  %v62_v26 = vmul.f32 %v309_v12, %v309_v12  ;;  %v49_v29 = vld [vmem:[#allocation5 + $0x28] sm:$0xff]  ;;  %v337_v30 = vld [vmem:[#allocation2 + $0x38] sm:$0xff] }
  0x2a   :  { %v77_v20 = vadd.f32 %v76_v10, %v54_v6  ;;  %v94_v24 = vadd.f32 %v69_v16, %v68_v14  ;;  %v57_v27 = vmul.f32 %v315_v15, %v315_v15  ;;  %v72_v31 = vmul.f32 %v325_v21, %v301_v7  ;;  %v50_v37 = vld [vmem:[#allocation5 + $0x30] sm:$0xff]  ;;  %v51_v44 = vld [vmem:[#allocation5 + $0x38] sm:$0xff]  ;;  %p224_p5 = por %p223_p4, %p222_p3 }
  0x2b   :  { %v63_v33 = vmul.f32 %v311_v13, %v311_v13  ;;  %v85_v34 = vadd.f32 %v61_v25, %v60_v18  ;;  %v58_v35 = vmul.f32 %v327_v22, %v327_v22  ;;  %v73_v38 = vmul.f32 %v49_v29, %v315_v15 }
  0x2c   :  { %v78_v28 = vadd.f32 %v77_v20, %v55_v9  ;;  %v95_v32 = vadd.f32 %v94_v24, %v70_v17  ;;  %v64_v40 = vmul.f32 %v325_v21, %v325_v21  ;;  %v59_v42 = vmul.f32 %v337_v30, %v337_v30  ;;  %p225_p6 = pnand %p224_p5, %p218_p2 }
  0x2d   :  { %v86_v41 = vadd.f32 %v85_v34, %v62_v26  ;;  %v74_v45 = vmul.f32 %v50_v37, %v327_v22  ;;  %v65_v47 = vmul.f32 %v49_v29, %v49_v29  ;;  %v75_v50 = vmul.f32 %v51_v44, %v337_v30 }
  0x2e   :  { %v79_v36 = vadd.f32 %v78_v28, %v56_v19  ;;  %v96_v39 = vadd.f32 %v95_v32, %v71_v23  ;;  %v66_v52 = vmul.f32 %v50_v37, %v50_v37  ;;  %v67_v56 = vmul.f32 %v51_v44, %v51_v44 }
  0x2f   :  { %v87_v48 = vadd.f32 %v86_v41, %v63_v33 }
  0x30   :  { %v80_v43 = vadd.f32 %v79_v36, %v57_v27  ;;  %v97_v46 = vadd.f32 %v96_v39, %v72_v31 }
  0x31   :  { %v88_v53 = vadd.f32 %v87_v48, %v64_v40 }
  0x32   :  { %v81_v49 = vadd.f32 %v80_v43, %v58_v35  ;;  %v98_v51 = vadd.f32 %v97_v46, %v73_v38 }
  0x33   :  { %v89_v57 = vadd.f32 %v88_v53, %v65_v47 }
  0x34   :  { %v82_v54 = vadd.f32 %v81_v49, %v59_v42  ;;  %v99_v55 = vadd.f32 %v98_v51, %v74_v45 }
  0x35   :  { %v90_v59 = vadd.f32 %v89_v57, %v66_v52 }
  0x36   :  { %83 = vadd.xlane.f32.xlu0 %v82_v54  ;;  %v100_v58 = vadd.f32 %v99_v55, %v75_v50 }
  0x37   :  { %v91_v60 = vadd.f32 %v90_v59, %v67_v56 }
  0x38   :  { %101 = vadd.xlane.f32.xlu1 %v100_v58 }
  0x3a   :  { %92 = vadd.xlane.f32.xlu0 %v91_v60 }
  0xc3   :  { %v84_v61 = vpop.xlane.xlu0 %83 }
  0xc4   :  { %v103_v62 = vmax.f32 %v84_v61, 1e-24 }
  0xc5   :  { %v102_v4 = vpop.xlane.xlu1 %101 }
  0xc6   :  { %169 = vrsqrt.f32 %v103_v62 }
  0xc7   :  { %v93_v5 = vpop.xlane.xlu0 %92 }
  0xc8   :  { %v105_v14 = vmul.f32 0.0025, %v93_v5 }
  0xd0   :  { %v170_v63 = vpop.eup %169 }
  0xd1   :  { %v106_v6 = vmul.f32 %v170_v63, %v84_v61  ;;  %v110_v10 = vmul.f32 %v170_v63, %v102_v4  ;;  %v116_v23 = vmul.f32 0.95, %v170_v63 }
  0xd3   :  { %v107_v9 = vmul.f32 %v170_v63, %v106_v6  ;;  %v111_v17 = vmul.f32 0.095, %v110_v10 }
  0xd5   :  { %v108_v16 = vmul.f32 0.9025, %v107_v9 }
  0xd7   :  { %v109_v18 = vadd.f32 %v108_v16, %v105_v14 }
  0xd9   :  { %v112_v19 = vadd.f32 %v111_v17, %v109_v18 }
  0xdb   :  { %v113_v20 = vmax.f32 %v112_v19, 1e-24 }
  0xdd   :  { %171 = vrsqrt.f32 %v113_v20 }
  0xe7   :  { %v172_v24 = vpop.eup %171 }
  0xe8   :  { %v115_v25 = vmul.f32 0.05, %v172_v24  ;;  %v117_v26 = vmul.f32 %v172_v24, %v116_v23 }
  0xea   :  { %v118_v27 = vmul.f32 %v115_v25, %v303_v8  ;;  %v119_v28 = vmul.f32 %v115_v25, %v307_v11  ;;  %v120_v31 = vmul.f32 %v115_v25, %v309_v12  ;;  %v121_v32 = vmul.f32 %v115_v25, %v311_v13 }
  0xeb   :  { %v122_v33 = vmul.f32 %v115_v25, %v325_v21  ;;  %v123_v34 = vmul.f32 %v115_v25, %v49_v29  ;;  %v124_v35 = vmul.f32 %v115_v25, %v50_v37  ;;  %v125_v36 = vmul.f32 %v115_v25, %v51_v44 }
  0xec   :  { %v126_v38 = vmul.f32 %v117_v26, %v287_v0  ;;  %v127_v39 = vmul.f32 %v117_v26, %v289_v1  ;;  %v128_v40 = vmul.f32 %v117_v26, %v291_v2  ;;  %v129_v41 = vmul.f32 %v117_v26, %v293_v3 }
  0xed   :  { %v130_v8 = vmul.f32 %v117_v26, %v301_v7  ;;  %v131_v11 = vmul.f32 %v117_v26, %v315_v15  ;;  %v132_v12 = vmul.f32 %v117_v26, %v327_v22  ;;  %v133_v13 = vmul.f32 %v117_v26, %v337_v30 }
  0xee   :  { %v134_v21 = vadd.f32 %v126_v38, %v118_v27  ;;  %v135_v29 = vadd.f32 %v127_v39, %v119_v28  ;;  %v136_v37 = vadd.f32 %v128_v40, %v120_v31  ;;  %v137_v0 = vadd.f32 %v129_v41, %v121_v32 }
  0xef   :  { %v138_v42 = vadd.f32 %v130_v8, %v122_v33  ;;  %v139_v1 = vadd.f32 %v131_v11, %v123_v34  ;;  %v140_v43 = vadd.f32 %v132_v12, %v124_v35  ;;  %v141_v2 = vadd.f32 %v133_v13, %v125_v36 }
  0xf0   :  { %142 = vst [vmem:[#allocation7] sm:$0xff] %v134_v21  ;;  %143 = vst [vmem:[#allocation7 + $0x8] sm:$0xff] %v135_v29 }
  0xf1   :  { %144 = vst [vmem:[#allocation7 + $0x10] sm:$0xff] %v136_v37  ;;  %145 = vst [vmem:[#allocation7 + $0x18] sm:$0xff] %v137_v0 }
  0xf2   :  { %146 = vst [vmem:[#allocation7 + $0x20] sm:$0xff] %v138_v42  ;;  %147 = vst [vmem:[#allocation7 + $0x28] sm:$0xff] %v139_v1 }
  0xf3   :  { %148 = vst [vmem:[#allocation7 + $0x30] sm:$0xff] %v140_v43  ;;  %149 = vst [vmem:[#allocation7 + $0x38] sm:$0xff] %v141_v2 }
  0xf4   :  { %228 = shalt.err (!%p225_p6)
}
  0xf5   :  { %s229_s8 = scalar_lea.hbm %s379_s2, 1024 }
  0xf6   :  { %p230_p7 = scmp.ne.s32.totalorder %s379_s2, %s229_s8  ;;  %p233_p8 = scmp.lt.u32.totalorder %s229_s8, %s379_s2 }
  0xf8   :  { %p235_p9 = pnand %p233_p8, %p230_p7 }
  0xfa   :  { %238 = shalt.err (!%p235_p9)
}
  0xfb   :  { %159 = dma.vmem_to_hbm [thread:$0]  %s157_s4, 1024, %s379_s2, [#allocation4]  }
  0xfc   :  { %243 = dma.done.wait [#allocation4], 1024  }
  0xfd   :  { %244 = vsyncadd [#allocation4], 4294966272 }
  0xfe   :  { %163 = vsyncpa [#allocation3], 1 }
  0xff   :  { %164 = vsyncpa [#allocation6], 1 }
 0x100   :  { %165 = vsyncpa [#allocation4], 1 }

</bundles_post_ra>
